<compile_context>
chip_gen: v6e
topology: v6e:2x2x1
jax: 0.10.0
libtpu: 0.0.40
codegen_flags: <defaults>
</compile_context>

<pallas_src>
import jax
import jax.numpy as jnp
from jax.experimental import pallas as pl
from jax.experimental.pallas import tpu as pltpu


# ---------------------------------------------------------------------------
# Kernel
# ---------------------------------------------------------------------------
def _vertical_attention_kernel(x_ref, w1_ref, b1_ref, w2_ref, out_ref, attn_ref):
    # x_ref:   (TB, S, D)  batch tile, native dtype
    # w1_ref:  (D, H)      linear1 weight (pre-transposed), native dtype
    # b1_ref:  (1, H)      linear1 bias, f32
    # w2_ref:  (1, H)      linear2 weight row, f32
    # out_ref: (TB, D)
    # attn_ref:(TB, S)
    tb, s, d = x_ref.shape
    h = w1_ref.shape[1]

    # linear1 + tanh: one flattened (TB*S, D) @ (D, H) MXU matmul, f32 accumulate.
    x_flat = x_ref[...].reshape(tb * s, d)                      # native dtype
    hidden = jnp.tanh(
        jnp.dot(x_flat, w1_ref[...], preferred_element_type=jnp.float32)
        + b1_ref[...])                                          # (TB*S, H) f32

    # linear2 (bias omitted: softmax is shift-invariant) -> scores (TB, S).
    hidden3 = hidden.reshape(tb, s, h)
    scores = jnp.sum(hidden3 * w2_ref[...], axis=-1)            # (TB, S) f32

    # softmax over the sequence axis (PyTorch dim=1) -- dense lane reduces.
    m = jnp.max(scores, axis=-1, keepdims=True)
    e = jnp.exp(scores - m)
    denom = jnp.sum(e, axis=-1, keepdims=True)
    # approx=False keeps exact-division accuracy (needed for the 1e-5 self-test);
    # flip to approx=True if ~1e-3 relative error on attn is acceptable.
    attn = e * pl.reciprocal(denom, approx=False)               # (TB, S) f32

    attn_ref[...] = attn.astype(attn_ref.dtype)

    # Weighted sum over S.  x is re-read and cast transiently (no long-lived
    # f32 copy of the largest operand spanning the whole kernel).
    x_f32 = x_ref[...].astype(jnp.float32)                      # (TB, S, D)
    out_ref[...] = jnp.sum(attn[:, :, None] * x_f32, axis=1).astype(out_ref.dtype)


# ---------------------------------------------------------------------------
# Tiling / VMEM budgeting helpers
# ---------------------------------------------------------------------------
def _sub_pad(n):   # sublane padding (second-to-last dim)
    return max(-(-n // 8) * 8, 8)


def _lane_pad(n):  # lane padding (last dim)
    return max(-(-n // 128) * 128, 128)


def _per_batch_row_bytes(S, D, H, x_itemsize):
    """Padded VMEM bytes contributed by one batch row of the tile (lane padding
    of D and H up to 128 is what dominates; pipelined tiles are 2x buffered)."""
    x_tile = 2 * _sub_pad(S) * _lane_pad(D) * x_itemsize   # x tile, double-buffered
    x_f32 = _sub_pad(S) * _lane_pad(D) * 4                 # transient f32 cast
    hidden = S * _lane_pad(H) * 4                          # (TB*S, H) f32
    out_t = 2 * _lane_pad(D) * 4                           # out tile, double-buffered
    attn_t = 2 * _lane_pad(S) * 4                          # attn tile, double-buffered
    return x_tile + x_f32 + hidden + out_t + attn_t


def _choose_tiling(B, S, D, H, x_itemsize, block_b=None, vmem_budget=16 << 20):
    """Pick (TB, Bp, grid): biggest multiple-of-8 batch tile fitting the VMEM
    budget; grid kept a multiple of 2 whenever B > 8 (v7x has 2 TensorCores)."""
    per_row = _per_batch_row_bytes(S, D, H, x_itemsize)
    tb_cap = max(8, (vmem_budget // per_row) // 8 * 8)

    if block_b is not None:
        tb = max(8, -(-block_b // 8) * 8)
    elif B <= 8:
        tb = 8
    else:
        n_steps = max(2, -(-B // tb_cap))
        n_steps += n_steps % 2                      # even -> both v7x TCs busy
        tb = -(-(-(-B // n_steps)) // 8) * 8        # ceil(B/n) rounded up to x8
        tb = min(tb, tb_cap)

    bp = -(-B // tb) * tb
    grid = bp // tb
    footprint = per_row * tb + _sub_pad(D) * _lane_pad(H) * x_itemsize  # + resident W1
    return tb, bp, grid, footprint


# ---------------------------------------------------------------------------
# Wrapper
# ---------------------------------------------------------------------------
def vertical_attention(x, w1, b1, w2, b2=None, *, block_b=None):
    """x: (B, S, D); w1: (D, H) (pre-transposed); b1: (H,); w2: (H,); b2: scalar.

    Returns (output (B, D), attention_weights (B, S, 1)) matching the PyTorch
    module.  `b2` is accepted for API parity but unused: softmax is
    shift-invariant, so the linear2 bias cannot affect either output.
    """
    del b2  # mathematically a no-op before softmax
    B, S, D = x.shape
    H = w1.shape[1]

    b1_2d = b1.reshape(1, H).astype(jnp.float32)
    w2_2d = w2.reshape(1, H).astype(jnp.float32)

    TB, Bp, grid, footprint = _choose_tiling(B, S, D, H, x.dtype.itemsize,
                                             block_b=block_b)
    xp = x if Bp == B else jnp.pad(x, ((0, Bp - B), (0, 0), (0, 0)))

    # Scoped VMEM: padded footprint + generous headroom, capped safely under the
    # v7x 64 MiB physical ceiling (v5e/v6e have 128 MiB).
    vmem_limit = int(min(max(2 * footprint + (4 << 20), 16 << 20), 48 << 20))

    out, attn = pl.pallas_call(
        _vertical_attention_kernel,
        out_shape=(
            jax.ShapeDtypeStruct((Bp, D), x.dtype),
            jax.ShapeDtypeStruct((Bp, S), x.dtype),
        ),
        grid_spec=pltpu.PrefetchScalarGridSpec(
            num_scalar_prefetch=0,
            grid=(grid,),
            in_specs=[
                pl.BlockSpec((TB, S, D), lambda b: (b, 0, 0)),   # x batch tile
                pl.BlockSpec((D, H), lambda b: (0, 0)),          # W1 (resident, native dtype)
                pl.BlockSpec((1, H), lambda b: (0, 0)),          # b1
                pl.BlockSpec((1, H), lambda b: (0, 0)),          # w2
            ],
            out_specs=[
                pl.BlockSpec((TB, D), lambda b: (b, 0)),         # out slab
                pl.BlockSpec((TB, S), lambda b: (b, 0)),         # attn (lane-dense)
            ],
        ),
        compiler_params=pltpu.CompilerParams(
            dimension_semantics=("parallel",),
            vmem_limit_bytes=vmem_limit,
        ),
    )(xp, w1, b1_2d, w2_2d)

    out = out[:B]
    attn = attn[:B].reshape(B, S, 1)   # match PyTorch (B, S, 1) attention weights
    return out, attn


# ---------------------------------------------------------------------------
# Pure-JAX reference & self-test
# ---------------------------------------------------------------------------
def reference(x, w1, b1, w2, b2):
    hidden = jnp.tanh(jnp.einsum("bsd,dh->bsh", x, w1) + b1)
    scores = jnp.einsum("bsh,h->bs", hidden, w2)[..., None] + b2
    attn = jax.nn.softmax(scores, axis=1)
    out = jnp.sum(attn * x, axis=1)
    return out, attn


if __name__ == "__main__":
    key = jax.random.PRNGKey(0)
    # batch, seq (softmax axis), input_dim, hidden_dim
    B, S, D, H = 16, 8, 16, 32

    kx, k1, k2, k3, k4 = jax.random.split(key, 5)
    x = jax.random.normal(kx, (B, S, D), dtype=jnp.float32)

    # Deterministic init mimicking nn.Linear default (uniform +/- 1/sqrt(fan_in)).
    lim1 = 1.0 / jnp.sqrt(D)
    w1 = jax.random.uniform(k1, (D, H), minval=-lim1, maxval=lim1, dtype=jnp.float32)
    b1 = jax.random.uniform(k2, (H,), minval=-lim1, maxval=lim1, dtype=jnp.float32)
    lim2 = 1.0 / jnp.sqrt(H)
    w2 = jax.random.uniform(k3, (H,), minval=-lim2, maxval=lim2, dtype=jnp.float32)
    b2 = jax.random.uniform(k4, (), minval=-lim2, maxval=lim2, dtype=jnp.float32)

    out, attn = vertical_attention(x, w1, b1, w2, b2)
    out, attn = jax.block_until_ready(out), jax.block_until_ready(attn)

    ref_out, ref_attn = reference(x, w1, b1, w2, b2)
    assert out.shape == (B, D) and attn.shape == (B, S, 1)
    assert jnp.allclose(out, ref_out, atol=1e-5, rtol=1e-5)
    assert jnp.allclose(attn, ref_attn, atol=1e-5, rtol=1e-5)

    print("KERNEL_OK")
</pallas_src>

<mosaic_0001>
module attributes {stable_mosaic.version = 11 : i64} {
  func.func @_vertical_attention_kernel(%arg0: i32, %arg1: memref<8x8x16xf32, #tpu.memory_space<vmem>>, %arg2: memref<16x32xf32, #tpu.memory_space<vmem>>, %arg3: memref<1x32xf32, #tpu.memory_space<vmem>>, %arg4: memref<1x32xf32, #tpu.memory_space<vmem>>, %arg5: memref<8x16xf32, #tpu.memory_space<vmem>>, %arg6: memref<8x8xf32, #tpu.memory_space<vmem>>) attributes {dimension_semantics = [#tpu.dimension_semantics<parallel>], iteration_bounds = array<i64: 2>, scalar_prefetch = 0 : i64, scratch_operands = 0 : i64, tpu.core_type = #tpu.core_type<tc>, window_params = [{transform_indices = @transform_0, window_bounds = array<i64: 8, 8, 16>}, {pipeline_mode = #tpu.pipeline_mode<synchronous>, transform_indices = @transform_1, window_bounds = array<i64: 16, 32>}, {pipeline_mode = #tpu.pipeline_mode<synchronous>, transform_indices = @transform_2, window_bounds = array<i64: 1, 32>}, {pipeline_mode = #tpu.pipeline_mode<synchronous>, transform_indices = @transform_3, window_bounds = array<i64: 1, 32>}, {transform_indices = @transform_4, window_bounds = array<i64: 8, 16>}, {transform_indices = @transform_5, window_bounds = array<i64: 8, 8>}]} {
    %c0 = arith.constant 0 : index
    %c0_0 = arith.constant 0 : index
    %c0_1 = arith.constant 0 : index
    %0 = vector.load %arg1[%c0, %c0_0, %c0_1] : memref<8x8x16xf32, #tpu.memory_space<vmem>>, vector<8x8x16xf32>
    %1 = vector.shape_cast %0 : vector<8x8x16xf32> to vector<64x16xf32>
    %c0_2 = arith.constant 0 : index
    %c0_3 = arith.constant 0 : index
    %2 = vector.load %arg2[%c0_2, %c0_3] : memref<16x32xf32, #tpu.memory_space<vmem>>, vector<16x32xf32>
    %cst = arith.constant dense<0.000000e+00> : vector<64x32xf32>
    %3 = tpu.matmul %1, %2, %cst {dimension_numbers = #tpu.dot_dimension_numbers<[1], [0], [0], [1], [0, 0, 1, 1], [], []>} : vector<64x16xf32>, vector<16x32xf32>, vector<64x32xf32> -> vector<64x32xf32>
    %c0_4 = arith.constant 0 : index
    %c0_5 = arith.constant 0 : index
    %4 = vector.load %arg3[%c0_4, %c0_5] : memref<1x32xf32, #tpu.memory_space<vmem>>, vector<1x32xf32>
    %5 = vector.broadcast %4 : vector<1x32xf32> to vector<64x32xf32>
    %6 = arith.addf %3, %5 : vector<64x32xf32>
    %7 = math.tanh %6 : vector<64x32xf32>
    %8 = vector.shape_cast %7 : vector<64x32xf32> to vector<8x8x32xf32>
    %c0_6 = arith.constant 0 : index
    %c0_7 = arith.constant 0 : index
    %9 = vector.load %arg4[%c0_6, %c0_7] : memref<1x32xf32, #tpu.memory_space<vmem>>, vector<1x32xf32>
    %10 = vector.shape_cast %9 : vector<1x32xf32> to vector<1x1x32xf32>
    %11 = vector.broadcast %10 : vector<1x1x32xf32> to vector<8x8x32xf32>
    %12 = arith.mulf %8, %11 : vector<8x8x32xf32>
    %cst_8 = arith.constant dense<0.000000e+00> : vector<8x8xf32>
    %13 = vector.multi_reduction <add>, %12, %cst_8 [2] : vector<8x8x32xf32> to vector<8x8xf32>
    %cst_9 = arith.constant dense<0xFF800000> : vector<8xf32>
    %14 = vector.multi_reduction <maximumf>, %13, %cst_9 [1] : vector<8x8xf32> to vector<8xf32>
    %15 = vector.shape_cast %14 : vector<8xf32> to vector<8x1xf32>
    %16 = vector.broadcast %15 : vector<8x1xf32> to vector<8x8xf32>
    %17 = arith.subf %13, %16 : vector<8x8xf32>
    %18 = math.exp %17 : vector<8x8xf32>
    %cst_10 = arith.constant dense<0.000000e+00> : vector<8xf32>
    %19 = vector.multi_reduction <add>, %18, %cst_10 [1] : vector<8x8xf32> to vector<8xf32>
    %20 = vector.shape_cast %19 : vector<8xf32> to vector<8x1xf32>
    %21 = tpu.reciprocal %20 : vector<8x1xf32> -> vector<8x1xf32>
    %22 = vector.broadcast %21 : vector<8x1xf32> to vector<8x8xf32>
    %23 = arith.mulf %18, %22 : vector<8x8xf32>
    %c0_11 = arith.constant 0 : index
    %c0_12 = arith.constant 0 : index
    %24 = vector.load %arg6[%c0_11, %c0_12] : memref<8x8xf32, #tpu.memory_space<vmem>>, vector<8x8xf32>
    tpu.vector_store %arg6[%c0_11, %c0_12], %23 {strides = array<i32>} : memref<8x8xf32, #tpu.memory_space<vmem>>, vector<8x8xf32>,
    %c0_13 = arith.constant 0 : index
    %c0_14 = arith.constant 0 : index
    %c0_15 = arith.constant 0 : index
    %25 = vector.load %arg1[%c0_13, %c0_14, %c0_15] : memref<8x8x16xf32, #tpu.memory_space<vmem>>, vector<8x8x16xf32>
    %26 = vector.shape_cast %23 : vector<8x8xf32> to vector<8x8x1xf32>
    %27 = vector.broadcast %26 : vector<8x8x1xf32> to vector<8x8x16xf32>
    %28 = arith.mulf %27, %25 : vector<8x8x16xf32>
    %cst_16 = arith.constant dense<0.000000e+00> : vector<8x16xf32>
    %29 = vector.multi_reduction <add>, %28, %cst_16 [1] : vector<8x8x16xf32> to vector<8x16xf32>
    %c0_17 = arith.constant 0 : index
    %c0_18 = arith.constant 0 : index
    %30 = vector.load %arg5[%c0_17, %c0_18] : memref<8x16xf32, #tpu.memory_space<vmem>>, vector<8x16xf32>
    tpu.vector_store %arg5[%c0_17, %c0_18], %29 {strides = array<i32>} : memref<8x16xf32, #tpu.memory_space<vmem>>, vector<8x16xf32>,
    return
  }
  func.func @transform_0(%arg0: i32) -> (i32, i32, i32) {
    %c0_i32 = arith.constant 0 : i32
    %c0_i32_0 = arith.constant 0 : i32
    %c0_i32_1 = arith.constant 0 : i32
    return %arg0, %c0_i32, %c0_i32_0 : i32, i32, i32
  }
  func.func @transform_1(%arg0: i32) -> (i32, i32) {
    %c0_i32 = arith.constant 0 : i32
    %c0_i32_0 = arith.constant 0 : i32
    %c0_i32_1 = arith.constant 0 : i32
    return %c0_i32, %c0_i32_0 : i32, i32
  }
  func.func @transform_2(%arg0: i32) -> (i32, i32) {
    %c0_i32 = arith.constant 0 : i32
    %c0_i32_0 = arith.constant 0 : i32
    %c0_i32_1 = arith.constant 0 : i32
    return %c0_i32, %c0_i32_0 : i32, i32
  }
  func.func @transform_3(%arg0: i32) -> (i32, i32) {
    %c0_i32 = arith.constant 0 : i32
    %c0_i32_0 = arith.constant 0 : i32
    %c0_i32_1 = arith.constant 0 : i32
    return %c0_i32, %c0_i32_0 : i32, i32
  }
  func.func @transform_4(%arg0: i32) -> (i32, i32) {
    %c0_i32 = arith.constant 0 : i32
    %c0_i32_0 = arith.constant 0 : i32
    return %arg0, %c0_i32 : i32, i32
  }
  func.func @transform_5(%arg0: i32) -> (i32, i32) {
    %c0_i32 = arith.constant 0 : i32
    %c0_i32_0 = arith.constant 0 : i32
    return %arg0, %c0_i32 : i32, i32
  }
}

</mosaic_0001>

<bundles_post_ra>
// kernel: tpu_custom_call.1
= control target key start
LH: loop header
LB: loop body
LE: loop exit
PB: predicated region body
PF: predicated region fallthrough
CT: control target
= control target key end

     0   :  { %11 = vsyncpa [#allocation3], 0  ;;  %s1671_s0 = inlined_call_operand.hbm [shape: f32[16,8,16], index: 0, kind: input, shape index: {}]   ;;  %s1672_s1 = inlined_call_operand.hbm [shape: f32[16,32], index: 1, kind: input, shape index: {}]   ;;  %s1673_s2 = inlined_call_operand.vmem [shape: f32[1,32], index: 2, kind: input, shape index: {}]   ;;  %s1674_s3 = inlined_call_operand.vmem [shape: f32[1,32], index: 3, kind: input, shape index: {}]   ;;  %s1675_s4 = inlined_call_operand.hbm [shape: f32[16,16], index: 4, kind: output, shape index: {0}]   ;;  %s1676_s5 = inlined_call_operand.vmem [shape: f32[16,8], index: 5, kind: output, shape index: {1}]  }
   0x1   :  { %13 = vsyncpa [#allocation3 + $0x1], 0 }
   0x2   :  { %14 = vsyncpa [#allocation6], 0 }
   0x3   :  { %15 = vsyncpa [#allocation4], 0 }
   0x4   :  { %17 = vsyncpa [#allocation4 + $0x1], 0  ;;  %s1324_s18 = smov 0   ;;  %s1326_s19 = smov 0  }
   0x5   :  { %s1328_s20 = smov 0   ;;  %s1330_s21 = smov 0  }
   0x6 LB: > { %s1345_s22 = sadd.s32 4294967295, %s1286_s21   ;;  %s1011_s23 = sadd.s32 4294967294, %s1286_s21   ;;  %s1286_s21 = sphi %s1330_s21, %s1700_s21   ;;  %s1282_s20 = sphi %s1328_s20, %s1699_s20   ;;  %s1278_s19 = sphi %s1326_s19, %s1698_s19   ;;  %s1274_s18 = sphi %s1324_s18, %s1697_s18  }
   0x7   : > { %p43_p0 = scmp.ne.s32.totalorder %s1278_s19, %s1274_s18  ;;  %p1677_p1 = scmp.eq.s32.totalorder %s1345_s22, 0 }
   0x8   : > { %p136_p3 = scmp.eq.s32.totalorder %s1011_s23, 1  ;;  %p1012_p5 = scmp.ge.s32.totalorder %s1286_s21, 1 }
   0x9   : > { %p1354_p4 = por %p1677_p1, %p43_p0  ;;  %p169_p7 = scmp.lt.s32.totalorder %s1286_s21, 3 }
   0xa   : > { %p1359_p6 = por %p136_p3, %p43_p0  ;;  %s1288_s27 = smov [#allocation5]  }
   0xb   : > { %s1682_s24 = scalar_select %p1354_p4, 1, 0 }
   0xc   : > { %s1683_s25 = scalar_select %p1359_p6, 1, 0 }
   0xd   : > { %p1364_p8 = pnand %p1012_p5, %p169_p7  ;;  %s181_s28 = sshll.u32 %s1288_s27, 4  ;;  %s182_s28 = int_to_ptr.vmem [resolvable:$true] %s181_s28 }
   0xe   : > { %s1378_s30 = sadd.s32 1, %s1286_s21   ;;  %s30_s6 = sadd.s32 1, %s1282_s20 }
   0xf   : > { %s1684_s26 = scalar_select %p1364_p8, 1, 0 }
  0x10   : > { %p1076_p9 = pneg %p1364_p8  ;;  %s27_s7 = ssub.s32 %s1286_s21, %s1378_s30 }
  0x11   : > { %s1175_s8 = scalar_lea.vmem %s182_s28, 256  ;;  %p1183_p5 = scmp.lt.s32.totalorder %s182_s28, %s182_s28 }
  0x12   : > { %p1373_p11 = pnand %p1076_p9, %p1677_p1  ;;  %p1176_p13 = scmp.ne.s32.totalorder %s182_s28, %s1175_s8 }
  0x13   : > { %p1184_p7 = scmp.lt.s32.totalorder %s1175_s8, %s1175_s8 }
  0x14   : > { %p1166_p12 = pneg %p1373_p11 }
  0x15   : > { %p1185_p10 = por %p1184_p7, %p1183_p5 }
  0x16   : > { %p1178_p0 = pnand %p1176_p13, %p1166_p12 }
  0x18   : > { %p1179_p3 = pneg %p1178_p0 }
  0x1a   : > { %p1186_p2 = pnand %p1185_p10, %p1179_p3 }
  0x1c   : > { %1189 = shalt.err (!%p1186_p2)
}
  0x1d   : > { %s1678_s9 = smov 128   ;;  %s1290_s10 = smov 8  }
  0x1e   : > { %1079 = dma.hbm_to_vmem [thread:$0]  (!%p1373_p11), %s1672_s1, 256, %s182_s28, [#allocation6], %s1678_s9, %s1678_s9, %s1290_s10  }
  0x1f   : > { %p28_p2 = scmp.eq.s32.totalorder %s27_s7, 0  ;;  %p37_p9 = scmp.ne.s32.totalorder %s1282_s20, %s1278_s19 }
  0x20   : > { %p38_p10 = scmp.eq.s32.totalorder %s1286_s21, 0  ;;  %p1089_p12 = scmp.lt.s32.totalorder %s1286_s21, 2 }
  0x21   : > { %s1398_s13 = scalar_select %p28_p2, %s1282_s20, %s30_s6  }
  0x22   : > { %p39_p13 = por %p38_p10, %p37_p9  ;;  %p1686_p0 = scmp.eq.s32.totalorder %s1345_s22, 1 }
  0x23   : > { %s201_s15 = sand.u32 1, %s1282_s20   ;;  %s1037_s16 = sshll.u32 %s1286_s21, 10 }
  0x24   : > { %p1402_p3 = por %p1686_p0, %p37_p9  ;;  %s1015_s17 = sshll.u32 %s201_s15, 6 }
  0x25   : > { %s1411_s29 = scalar_lea.hbm %s1671_s0, %s1037_s16  ;;  %s205_s28 = scalar_lea.vmem [#allocation2], %s1015_s17 }
  0x26   : > { %s1687_s14 = scalar_select %p1402_p3, 1, 0 }
  0x27   : > { %s212_s6 = sshll.u32 %s205_s28, 4  ;;  %p1413_p11 = pnand %p1089_p12, %p39_p13  ;;  %s1417_s6 = int_to_ptr.vmem [resolvable:$true] %s212_s6 }
  0x28   : > { %s1419_s8 = scalar_lea.sflag [#allocation3], %s201_s15  ;;  %s1190_s11 = scalar_lea.hbm %s1411_s29, 1024 }
  0x29   : > { %p1191_p5 = scmp.ne.s32.totalorder %s1411_s29, %s1190_s11  ;;  %p1192_p7 = pneg %p1413_p11 }
  0x2a   : > { %s1195_s17 = scalar_lea.hbm %s1671_s0, 2048  ;;  %p1196_p10 = scmp.lt.s32.totalorder %s1411_s29, %s1671_s0 }
  0x2b   : > { %p1193_p2 = pnand %p1192_p7, %p1191_p5  ;;  %p1197_p12 = scmp.lt.s32.totalorder %s1195_s17, %s1190_s11 }
  0x2d   : > { %p1194_p9 = pneg %p1193_p2  ;;  %p1198_p13 = por %p1197_p12, %p1196_p10 }
  0x2f   : > { %p1199_p0 = pnand %p1198_p13, %p1194_p9 }
  0x31   : > { %1202 = shalt.err (!%p1199_p0)
}
  0x32   : > { %s1203_s15 = scalar_lea.vmem %s1417_s6, 1024  ;;  %s1291_s28 = smov [#allocation2]  }
  0x33   : > { %p1204_p1 = scmp.ne.s32.totalorder %s1417_s6, %s1203_s15  ;;  %s1208_s9 = sshll.u32 %s1291_s28, 4  ;;  %s1209_s9 = int_to_ptr.vmem [resolvable:$false] %s1208_s9 }
  0x34   : > { %s1210_s12 = scalar_lea.vmem %s1209_s9, 2048  ;;  %p1211_p2 = scmp.lt.s32.totalorder %s1417_s6, %s1209_s9 }
  0x35   : > { %p1206_p6 = pnand %p1204_p1, %p1192_p7  ;;  %p1212_p3 = scmp.lt.s32.totalorder %s1210_s12, %s1203_s15 }
  0x37   : > { %p1207_p5 = pneg %p1206_p6  ;;  %p1213_p4 = por %p1212_p3, %p1211_p2 }
  0x39   : > { %p1214_p8 = pnand %p1213_p4, %p1207_p5 }
  0x3b   : > { %1217 = shalt.err (!%p1214_p8)
}
  0x3c   : > { %s1689_s11 = smov 128   ;;  %p1690_p1 = scmp.ne.s32.totalorder %s1684_s26, 0 }
  0x3d   : > { %1083 = dma.hbm_to_vmem [thread:$0]  (!%p1413_p11), %s1411_s29, 1024, %s1417_s6, %s1419_s8, %s1689_s11, %s1689_s11, %s1290_s10  }
  0x3e   : > { %224 = sbr.rel (%p1690_p1) target bundleno = 1093 (0x445), region = 36  ;;  %s1446_s16 = sand.u32 (!%p1690_p1), 1, %s1278_s19  }
  0x3f   : > { %s1019_s9 = sshll.u32 (!%p1690_p1), %s1446_s16, 6  ;;  %s227_s17 = scalar_lea.sflag (!%p1690_p1), [#allocation3], %s1446_s16 }
  0x40   : > { %s230_s23 = scalar_lea.vmem (!%p1690_p1), [#allocation2], %s1019_s9  ;;  %p1691_p4 = scmp.ne.s32.totalorder (!%p1690_p1), %s1682_s24, 0 }
  0x43   : > { %1261 = dma.done.wait (%p1691_p4), %s227_s17, 1024  }
  0x44   : > { %1263 = vsyncadd (%p1691_p4), %s227_s17, 4294966272  ;;  %p1692_p6 = scmp.eq.s32.totalorder %s1345_s22, 0 }
  0x46   : > { %1265 = dma.done.wait (%p1692_p6), [#allocation6], 256   ;;  %p1693_p8 = pmov %p1692_p6 }
  0x47   : > { %vm287_vm0 = vcmask 130048   ;;  %v279_v0 = vld [vmem:[#allocation5 + $0x8] sm:$0xff]  ;;  %v278_v1 = vld [vmem:[#allocation5] sm:$0xff]  ;;  %v1464_v4 = vld [vmem:[%s230_s23 + $0x10] sm:$0xff]  ;;  %vm440_vm1 = vcmask 261120   ;;  %v473_v52 = vlaneseq  ;;  %vm507_vm2 = vcmask 1041409  }
  0x48   : > { %1267 = vsyncadd (%p1693_p8), [#allocation6], 4294967040  ;;  %v1458_v2 = vld [vmem:[%s230_s23] sm:$0xff]  ;;  %1048 = vmatprep.subr.mxu0 %v279_v0  ;;  %v1462_v3 = vld [vmem:[%s230_s23 + $0x8] sm:$0xff]  ;;  %1064 = vmatprep.subr.mxu1 %v279_v0  ;;  %vm509_vm3 = vcmask 1042434   ;;  %vm511_vm4 = vcmask 1043459  }
  0x49   : > { %1052 = vmatprep.mubr.msk.f32.mxu0 %vm287_vm0, %v1458_v2  ;;  %1049 = vmatpush3.msra.mxu0 %v279_v0  ;;  %v1466_v5 = vld [vmem:[%s230_s23 + $0x20] sm:$0xff]  ;;  %v1468_v6 = vld [vmem:[%s230_s23 + $0x28] sm:$0xff]  ;;  %v1472_v7 = vld [vmem:[%s230_s23 + $0x30] sm:$0xff]  ;;  %v474_v53 = vand.u32 127, %v473_v52  ;;  %v1504_v54 = vshrl.u32 %v473_v52, 7  ;;  %vm513_vm5 = vcmask 1044484  }
  0x4a   : > { %1050 = vmatprep.subr.mxu0 %v278_v1  ;;  %1066 = vmatpush3.msra.mxu1 %v279_v0  ;;  %v1476_v8 = vld [vmem:[%s230_s23 + $0x18] sm:$0xff]  ;;  %v1023_v10 = vld [vmem:[%s1673_s2] ss:$0 sm:$0xff]  ;;  %vm515_vm6 = vcmask 1045509   ;;  %vm517_vm7 = vcmask 1046534   ;;  %vm519_vm8 = vcmask 1047559  }
  0x4b   : > { %1051 = vmatpush3.msra.mxu0 %v278_v1  ;;  %1065 = vmatprep.subr.mxu1 %v278_v1  ;;  %v1484_v9 = vld [vmem:[%s230_s23 + $0x38] sm:$0xff]  ;;  %v1032_v27 = vld [vmem:[%s1674_s3] ss:$0 sm:$0xff]  ;;  %v1507_v56 = vsub.s32 %v474_v53, %v1504_v54  ;;  %vm522_vm9 = vcmask 64512   ;;  %p266_p3 = scmp.lt.s32.totalorder %s1345_s22, 1  ;;  %s1021_s28 = sshll.u32 %s1446_s16, 3 }
  0x4c   : > { %1053 = vmatmul.mubr.msk.f32.vlgmr.msra.gmra.mxu0 %vm287_vm0, %v1462_v3  ;;  %1067 = vmatpush3.msra.mxu1 %v278_v1  ;;  %s1034_s12 = sshll.u32 %s1345_s22, 7  ;;  %s258_s11 = scalar_lea.vmem [#allocation7], %s1021_s28 }
  0x4d   : > { %1055 = vmatprep.mubr.msk.f32.mxu0 %vm287_vm0, %v1464_v4  ;;  %1058 = vmatprep.mubr.msk.f32.mxu1 %vm287_vm0, %v1466_v5  ;;  %s1597_s6 = scalar_select %p266_p3, %s1345_s22, 1 }
  0x4e   : > { %1059 = vmatmul.mubr.msk.f32.vlgmr.msra.gmra.mxu1 %vm287_vm0, %v1468_v6  ;;  %s904_s9 = sshll.u32 %s258_s11, 4  ;;  %s1632_s24 = scalar_lea.hbm %s1675_s4, %s1034_s12  ;;  %s905_s9 = int_to_ptr.vmem [resolvable:$true] %s904_s9 }
  0x4f   : > { %1061 = vmatprep.mubr.msk.f32.mxu1 %vm287_vm0, %v1472_v7  ;;  %s1022_s7 = sshll.u32 %s1597_s6, 3  ;;  %s887_s22 = scalar_lea.sflag [#allocation4], %s1446_s16 }
  0x50   : > { %1056 = vmatmul.mubr.msk.f32.gmra.mxu0 %vm287_vm0, %v1476_v8  ;;  %s269_s15 = scalar_lea.vmem %s1676_s5, %s1022_s7  ;;  %s1218_s26 = scalar_lea.vmem %s905_s9, 128 }
  0x51   : > { %p1219_p11 = scmp.ne.s32.totalorder %s905_s9, %s1218_s26  ;;  %p1694_p7 = scmp.ne.s32.totalorder %s1687_s14, 0 }
  0x52   : > { %1062 = vmatmul.mubr.msk.f32.gmra.mxu1 %vm287_vm0, %v1484_v9  ;;  %s1293_s10 = smov [#allocation7]  }
  0x53   : > { %p1220_p9 = pnand %p1219_p11, %p1694_p7  ;;  %s1222_s29 = sshll.u32 %s1293_s10, 4  ;;  %s1223_s29 = int_to_ptr.vmem [resolvable:$false] %s1222_s29 }
  0x54   : > { %s1224_s6 = scalar_lea.vmem %s1223_s29, 256  ;;  %p1225_p12 = scmp.lt.s32.totalorder %s905_s9, %s1223_s29 }
  0x55   : > { %p1221_p10 = pneg %p1220_p9  ;;  %p1226_p13 = scmp.lt.s32.totalorder %s1224_s6, %s1218_s26 }
  0x57   : > { %p1227_p0 = por %p1226_p13, %p1225_p12 }
  0x59   : > { %p1228_p5 = pnand %p1227_p0, %p1221_p10 }
 0x10c   : > { %v1054_v11 = vpop.f32.mrf.mxu0 }
 0x10d   : > { %v384_v12 = vadd.f32 %v1054_v11, %v1023_v10 }
 0x10e   : > { %v378_v13 = vpop.f32.mrf.mxu0  ;;  %v1060_v14 = vpop.f32.mrf.mxu1 }
 0x10f   : > { %1130 = vtanh.f32 %v384_v12  ;;  %v379_v15 = vadd.f32 %v1023_v10, %v378_v13  ;;  %v404_v21 = vadd.f32 %v1060_v14, %v1023_v10 }
 0x110   : > { %v1057_v16 = vpop.f32.mrf.mxu0  ;;  %v398_v17 = vpop.f32.mrf.mxu1 }
 0x111   : > { %1132 = vtanh.f32 %v379_v15  ;;  %v394_v18 = vadd.f32 %v1057_v16, %v1023_v10  ;;  %v399_v19 = vadd.f32 %v1023_v10, %v398_v17 }
 0x112   : > { %v388_v20 = vpop.f32.mrf.mxu0  ;;  %v1063_v22 = vpop.f32.mrf.mxu1 }
 0x113   : > { %1134 = vtanh.f32 %v394_v18  ;;  %v389_v23 = vadd.f32 %v1023_v10, %v388_v20  ;;  %v414_v26 = vadd.f32 %v1063_v22, %v1023_v10 }
 0x114   : > { %1136 = vtanh.f32 %v399_v19  ;;  %v408_v24 = vpop.f32.mrf.mxu1 }
 0x115   : > { %1138 = vtanh.f32 %v389_v23  ;;  %v409_v25 = vadd.f32 %v1023_v10, %v408_v24  ;;  %v1292_v24 = vmov 0  }
 0x116   : > { %1140 = vtanh.f32 %v404_v21  ;;  %1129 = vset.pattern.permute.xlu0 %v1292_v24  ;;  %1128 = vset.pattern.permute.xlu1 %v1292_v24 }
 0x117   : > { %1142 = vtanh.f32 %v409_v25  ;;  %v529_v25 = vsub.s32 0, %v1504_v54 }
 0x118   : > { %1144 = vtanh.f32 %v414_v26  ;;  %v533_v26 = vsub.s32 1, %v1504_v54 }
 0x11c   : > { %v1131_v28 = vpop.eup %1130 }
 0x11d   : > { %v433_v29 = vmul.f32 %v1131_v28, %v1032_v27  ;;  %v541_v28 = vsub.s32 3, %v1504_v54 }
 0x11e   : > { %v1133_v30 = vpop.eup %1132 }
 0x11f   : > { %v444_v31 = vsel %vm440_vm1, %v433_v29, 0.0  ;;  %v432_v32 = vmul.f32 %v1133_v30, %v1032_v27 }
 0x120   : > { %v1135_v33 = vpop.eup %1134  ;;  %445 = vadd.xlane.f32.xlu0 %v444_v31 }
 0x121   : > { %v1137_v34 = vpop.eup %1136  ;;  %v435_v35 = vmul.f32 %v1135_v33, %v1032_v27  ;;  %v441_v40 = vsel %vm440_vm1, %v432_v32, 0.0  ;;  %v545_v33 = vsub.s32 4, %v1504_v54 }
 0x122   : > { %v1139_v36 = vpop.eup %1138  ;;  %v436_v37 = vmul.f32 %v1137_v34, %v1032_v27 }
 0x123   : > { %v1141_v38 = vpop.eup %1140  ;;  %v450_v39 = vsel %vm440_vm1, %v435_v35, 0.0  ;;  %v434_v41 = vmul.f32 %v1139_v36, %v1032_v27 }
 0x124   : > { %v1143_v42 = vpop.eup %1142  ;;  %451 = vadd.xlane.f32.xlu1 %v450_v39  ;;  %442 = vadd.xlane.f32.xlu0 %v441_v40  ;;  %v453_v43 = vsel %vm440_vm1, %v436_v37, 0.0  ;;  %v437_v46 = vmul.f32 %v1141_v38, %v1032_v27  ;;  %v549_v40 = vsub.s32 5, %v1504_v54 }
 0x125   : > { %v438_v44 = vmul.f32 %v1143_v42, %v1032_v27  ;;  %v447_v45 = vsel %vm440_vm1, %v434_v41, 0.0  ;;  %v1145_v47 = vpop.eup %1144 }
 0x126   : > { %v456_v49 = vsel %vm440_vm1, %v437_v46, 0.0  ;;  %v439_v50 = vmul.f32 %v1145_v47, %v1032_v27  ;;  %v537_v27 = vsub.s32 2, %v1504_v54 }
 0x127   : > { %v459_v48 = vsel %vm440_vm1, %v438_v44, 0.0  ;;  %v553_v44 = vsub.s32 6, %v1504_v54 }
 0x128   : > { %448 = vadd.xlane.f32.xlu1 %v447_v45  ;;  %454 = vadd.xlane.f32.xlu0 %v453_v43  ;;  %v462_v51 = vsel %vm440_vm1, %v439_v50, 0.0 }
 0x12c   : > { %457 = vadd.xlane.f32.xlu1 %v456_v49  ;;  %460 = vadd.xlane.f32.xlu0 %v459_v48  ;;  %v557_v48 = vsub.s32 7, %v1504_v54 }
 0x130   : > { %463 = vadd.xlane.f32.xlu1 %v462_v51 }
 0x1a9   : > { %v446_v55 = vpop.xlane.xlu0 %445 }
 0x1aa   : > { %v482_v60 = vrot.slane %v446_v55, %v1507_v56 }
 0x1ad   : > { %v452_v57 = vpop.xlane.xlu1 %451  ;;  %v443_v58 = vpop.xlane.xlu0 %442 }
 0x1ae   : > { %v478_v59 = vrot.slane %v443_v58, %v1507_v56  ;;  %v490_v1 = vrot.slane %v452_v57, %v1507_v56 }
 0x1b0   : > { %v508_v10 = vsel %vm507_vm2, %v482_v60, %v478_v59 }
 0x1b1   : > { %v449_v61 = vpop.xlane.xlu1 %448  ;;  %v455_v62 = vpop.xlane.xlu0 %454 }
 0x1b2   : > { %v486_v63 = vrot.slane %v449_v61, %v1507_v56  ;;  %v494_v0 = vrot.slane %v455_v62, %v1507_v56 }
 0x1b4   : > { %v510_v11 = vsel %vm509_vm3, %v486_v63, %v508_v10 }
 0x1b5   : > { %v512_v12 = vsel %vm511_vm4, %v490_v1, %v510_v11  ;;  %v458_v13 = vpop.xlane.xlu1 %457  ;;  %v461_v14 = vpop.xlane.xlu0 %460 }
 0x1b6   : > { %v514_v15 = vsel %vm513_vm5, %v494_v0, %v512_v12  ;;  %v498_v16 = vrot.slane %v458_v13, %v1507_v56  ;;  %v502_v17 = vrot.slane %v461_v14, %v1507_v56 }
 0x1b8   : > { %v516_v18 = vsel %vm515_vm6, %v498_v16, %v514_v15 }
 0x1b9   : > { %v464_v19 = vpop.xlane.xlu1 %463  ;;  %v518_v21 = vsel %vm517_vm7, %v502_v17, %v516_v18 }
 0x1ba   : > { %v506_v20 = vrot.slane %v464_v19, %v1507_v56 }
 0x1bc   : > { %v520_v22 = vsel %vm519_vm8, %v506_v20, %v518_v21 }
 0x1bd   : > { %v523_v23 = vsel %vm522_vm9, %v520_v22, -inf }
 0x1be   : > { %524 = vmax.xlane.f32.xlu0 %v523_v23 }
 0x247   : > { %v525_v29 = vpop.xlane.xlu0 %524 }
 0x248   : > { %v530_v30 = vrot.slane %v525_v29, %v529_v25  ;;  %v534_v31 = vrot.slane %v525_v29, %v533_v26  ;;  %v538_v32 = vrot.slane %v525_v29, %v537_v27  ;;  %v542_v34 = vrot.slane %v525_v29, %v541_v28 }
 0x249   : > { %v546_v41 = vrot.slane %v525_v29, %v545_v33  ;;  %v550_v45 = vrot.slane %v525_v29, %v549_v40  ;;  %v554_v49 = vrot.slane %v525_v29, %v553_v44  ;;  %v558_v52 = vrot.slane %v525_v29, %v557_v48 }
 0x24a   : > { %v567_v35 = vsub.f32 %v443_v58, %v530_v30  ;;  %v568_v36 = vsub.f32 %v446_v55, %v534_v31  ;;  %v569_v37 = vsub.f32 %v449_v61, %v538_v32  ;;  %v570_v42 = vsub.f32 %v452_v57, %v542_v34 }
 0x24b   : > { %v571_v46 = vsub.f32 %v455_v62, %v546_v41  ;;  %v572_v50 = vsub.f32 %v458_v13, %v550_v45  ;;  %v573_v53 = vsub.f32 %v461_v14, %v554_v49  ;;  %v574_v59 = vsub.f32 %v464_v19, %v558_v52 }
 0x24c   : > { %v575_v38 = vmul.f32 1.442695, %v567_v35  ;;  %v577_v39 = vmul.f32 1.442695, %v568_v36  ;;  %v579_v43 = vmul.f32 1.442695, %v569_v37 }
 0x24d   : > { %v581_v47 = vmul.f32 1.442695, %v570_v42  ;;  %v583_v51 = vmul.f32 1.442695, %v571_v46  ;;  %v585_v55 = vmul.f32 1.442695, %v572_v50 }
 0x24e   : > { %1146 = vpow2.f32 %v575_v38  ;;  %v587_v60 = vmul.f32 1.442695, %v573_v53  ;;  %v589_v62 = vmul.f32 1.442695, %v574_v59 }
 0x24f   : > { %1148 = vpow2.f32 %v577_v39 }
 0x250   : > { %1150 = vpow2.f32 %v579_v43 }
 0x251   : > { %1152 = vpow2.f32 %v581_v47 }
 0x252   : > { %1154 = vpow2.f32 %v583_v51 }
 0x253   : > { %1156 = vpow2.f32 %v585_v55 }
 0x254   : > { %1158 = vpow2.f32 %v587_v60 }
 0x255   : > { %1160 = vpow2.f32 %v589_v62 }
 0x25b   : > { %v1147_v57 = vpop.eup %1146 }
 0x25c   : > { %v1149_v58 = vpop.eup %1148  ;;  %600 = vperm.xlu1 %1128, %v1147_v57  }
 0x25d   : > { %603 = vperm.xlu0 %1129, %v1149_v58   ;;  %v1151_v61 = vpop.eup %1150 }
 0x25e   : > { %v1153_v63 = vpop.eup %1152 }
 0x25f   : > { %v1155_v0 = vpop.eup %1154 }
 0x260   : > { %606 = vperm.xlu1 %1128, %v1151_v61   ;;  %v1157_v1 = vpop.eup %1156 }
 0x261   : > { %v1159_v10 = vpop.eup %1158 }
 0x262   : > { %v1161_v11 = vpop.eup %1160 }
 0x264   : > { %609 = vperm.xlu1 %1128, %v1153_v63  }
 0x268   : > { %612 = vperm.xlu1 %1128, %v1155_v0  }
 0x26c   : > { %615 = vperm.xlu1 %1128, %v1157_v1  }
 0x270   : > { %618 = vperm.xlu1 %1128, %v1159_v10  }
 0x274   : > { %621 = vperm.xlu1 %1128, %v1161_v11  }
 0x2d7   : > { %v601_v12 = vpop.permute.xlu1 %600 }
 0x2d8   : > { %v604_v16 = vpop.permute.xlu0 %603  ;;  %v626_v19 = vrot.slane %v601_v12, %v1507_v56 }
 0x2d9   : > { %v630_v18 = vrot.slane %v604_v16, %v1507_v56 }
 0x2db   : > { %v607_v13 = vpop.permute.xlu1 %606  ;;  %v655_v24 = vsel %vm507_vm2, %v630_v18, %v626_v19 }
 0x2dc   : > { %v634_v20 = vrot.slane %v607_v13, %v1507_v56 }
 0x2de   : > { %v656_v30 = vsel %vm509_vm3, %v634_v20, %v655_v24 }
 0x2df   : > { %v610_v14 = vpop.permute.xlu1 %609 }
 0x2e0   : > { %v638_v21 = vrot.slane %v610_v14, %v1507_v56 }
 0x2e2   : > { %v657_v32 = vsel %vm511_vm4, %v638_v21, %v656_v30 }
 0x2e3   : > { %v613_v15 = vpop.permute.xlu1 %612 }
 0x2e4   : > { %v642_v22 = vrot.slane %v613_v15, %v1507_v56 }
 0x2e6   : > { %v658_v34 = vsel %vm513_vm5, %v642_v22, %v657_v32 }
 0x2e7   : > { %v616_v17 = vpop.permute.xlu1 %615 }
 0x2e8   : > { %v646_v29 = vrot.slane %v616_v17, %v1507_v56 }
 0x2ea   : > { %v659_v36 = vsel %vm515_vm6, %v646_v29, %v658_v34 }
 0x2eb   : > { %v619_v23 = vpop.permute.xlu1 %618 }
 0x2ec   : > { %v650_v31 = vrot.slane %v619_v23, %v1507_v56 }
 0x2ee   : > { %v660_v38 = vsel %vm517_vm7, %v650_v31, %v659_v36 }
 0x2ef   : > { %v622_v35 = vpop.permute.xlu1 %621 }
 0x2f0   : > { %v654_v37 = vrot.slane %v622_v35, %v1507_v56 }
 0x2f2   : > { %v661_v39 = vsel %vm519_vm8, %v654_v37, %v660_v38 }
 0x2f3   : > { %v663_v41 = vsel %vm522_vm9, %v661_v39, 0.0 }
 0x2f4   : > { %664 = vadd.xlane.f32.xlu1 %v663_v41 }
 0x37d   : > { %v665_v42 = vpop.xlane.xlu1 %664 }
 0x37e   : > { %1162 = vrcp.f32 %v665_v42 }
 0x38b   : > { %v1163_v43 = vpop.eup %1162 }
 0x38c   : > { %v671_v45 = vrot.slane %v1163_v43, %v529_v25  ;;  %v675_v47 = vrot.slane %v1163_v43, %v533_v26  ;;  %v679_v50 = vrot.slane %v1163_v43, %v537_v27  ;;  %v683_v52 = vrot.slane %v1163_v43, %v541_v28 }
 0x38d   : > { %v687_v55 = vrot.slane %v1163_v43, %v545_v33  ;;  %v691_v26 = vrot.slane %v1163_v43, %v549_v40  ;;  %v695_v27 = vrot.slane %v1163_v43, %v553_v44  ;;  %v699_v28 = vrot.slane %v1163_v43, %v557_v48 }
 0x38e   : > { %v708_v46 = vmul.f32 %v1147_v57, %v671_v45  ;;  %v709_v49 = vmul.f32 %v1149_v58, %v675_v47  ;;  %v710_v51 = vmul.f32 %v1151_v61, %v679_v50  ;;  %v711_v53 = vmul.f32 %v1153_v63, %v683_v52 }
 0x38f   : > { %v712_v25 = vmul.f32 %v1155_v0, %v687_v55  ;;  %v713_v57 = vmul.f32 %v1157_v1, %v691_v26  ;;  %v714_v58 = vmul.f32 %v1159_v10, %v695_v27  ;;  %v715_v59 = vmul.f32 %v1161_v11, %v699_v28 }
 0x390   : > { %725 = vperm.xlu0 %1129, %v708_v46  }
 0x394   : > { %728 = vperm.xlu0 %1129, %v709_v49  }
 0x398   : > { %731 = vperm.xlu0 %1129, %v710_v51  }
 0x39c   : > { %734 = vperm.xlu0 %1129, %v711_v53  }
 0x3a0   : > { %737 = vperm.xlu0 %1129, %v712_v25  }
 0x3a4   : > { %740 = vperm.xlu0 %1129, %v713_v57  }
 0x3a8   : > { %743 = vperm.xlu0 %1129, %v714_v58  }
 0x3ac   : > { %746 = vperm.xlu0 %1129, %v715_v59  }
 0x40b   : > { %v726_v60 = vpop.permute.xlu0 %725 }
 0x40c   : > { %v805_v62 = vmul.f32 %v726_v60, %v1458_v2  ;;  %v751_v22 = vrot.slane %v726_v60, %v1507_v56 }
 0x40e   : > { %v813_v0 = vsel %vm287_vm0, %v805_v62, 0.0 }
 0x40f   : > { %v729_v33 = vpop.permute.xlu0 %728  ;;  %v814_v11 = vrot.slane %v813_v0, 4 }
 0x410   : > { %v806_v61 = vmul.f32 %v729_v33, %v1462_v3 }
 0x411   : > { %v815_v15 = vadd.f32 %v814_v11, %v813_v0 }
 0x412   : > { %v820_v44 = vsel %vm287_vm0, %v806_v61, 0.0 }
 0x413   : > { %v732_v40 = vpop.permute.xlu0 %731  ;;  %v821_v10 = vrot.slane %v820_v44, 4 }
 0x414   : > { %v807_v63 = vmul.f32 %v732_v40, %v1464_v4  ;;  %v759_v24 = vrot.slane %v732_v40, %v1507_v56 }
 0x415   : > { %v822_v4 = vadd.f32 %v821_v10, %v820_v44 }
 0x416   : > { %v827_v54 = vsel %vm287_vm0, %v807_v63, 0.0 }
 0x417   : > { %v735_v48 = vpop.permute.xlu0 %734  ;;  %v828_v12 = vrot.slane %v827_v54, 4  ;;  %v823_v23 = vrot.slane %v822_v4, 2 }
 0x418   : > { %v808_v1 = vmul.f32 %v735_v48, %v1476_v8  ;;  %v755_v8 = vrot.slane %v729_v33, %v1507_v56  ;;  %v763_v31 = vrot.slane %v735_v48, %v1507_v56 }
 0x419   : > { %v829_v16 = vadd.f32 %v828_v12, %v827_v54  ;;  %v824_v42 = vadd.f32 %v823_v23, %v822_v4 }
 0x41a   : > { %v834_v3 = vsel %vm287_vm0, %v808_v1, 0.0  ;;  %v780_v37 = vsel %vm507_vm2, %v755_v8, %v751_v22 }
 0x41b   : > { %v835_v13 = vrot.slane %v834_v3, 4  ;;  %v738_v2 = vpop.permute.xlu0 %737  ;;  %v830_v30 = vrot.slane %v829_v16, 2  ;;  %v781_v43 = vsel %vm509_vm3, %v759_v24, %v780_v37  ;;  %v825_v28 = vrot.slane %v824_v42, 1 }
 0x41c   : > { %v809_v14 = vmul.f32 %v738_v2, %v1466_v5  ;;  %v816_v5 = vrot.slane %v815_v15, 2  ;;  %v767_v35 = vrot.slane %v738_v2, %v1507_v56  ;;  %v782_v50 = vsel %vm511_vm4, %v763_v31, %v781_v43 }
 0x41d   : > { %v836_v18 = vadd.f32 %v835_v13, %v834_v3  ;;  %v831_v49 = vadd.f32 %v830_v30, %v829_v16  ;;  %v826_v48 = vadd.f32 %v825_v28, %v824_v42 }
 0x41e   : > { %v841_v17 = vsel %vm287_vm0, %v809_v14, 0.0  ;;  %v817_v47 = vadd.f32 %v816_v5, %v815_v15  ;;  %v783_v53 = vsel %vm513_vm5, %v767_v35, %v782_v50 }
 0x41f   : > { %v842_v19 = vrot.slane %v841_v17, 4  ;;  %v741_v20 = vpop.permute.xlu0 %740  ;;  %v837_v34 = vrot.slane %v836_v18, 2  ;;  %v832_v61 = vrot.slane %v831_v49, 1 }
 0x420   : > { %v810_v21 = vmul.f32 %v741_v20, %v1468_v6  ;;  %v771_v39 = vrot.slane %v741_v20, %v1507_v56  ;;  %v818_v63 = vrot.slane %v817_v47, 1 }
 0x421   : > { %v843_v29 = vadd.f32 %v842_v19, %v841_v17  ;;  %v838_v52 = vadd.f32 %v837_v34, %v836_v18  ;;  %v833_v11 = vadd.f32 %v832_v61, %v831_v49 }
 0x422   : > { %v848_v32 = vsel %vm287_vm0, %v810_v21, 0.0  ;;  %v784_v57 = vsel %vm515_vm6, %v771_v39, %v783_v53  ;;  %v819_v12 = vadd.f32 %v818_v63, %v817_v47 }
 0x423   : > { %v849_v36 = vrot.slane %v848_v32, 4  ;;  %v744_v6 = vpop.permute.xlu0 %743  ;;  %v844_v38 = vrot.slane %v843_v29, 2  ;;  %v839_v44 = vrot.slane %v838_v52, 1 }
 0x424   : > { %v811_v41 = vmul.f32 %v744_v6, %v1472_v7  ;;  %v775_v46 = vrot.slane %v744_v6, %v1507_v56  ;;  %v877_v4 = vsel %vm507_vm2, %v826_v48, %v819_v12 }
 0x425   : > { %v850_v45 = vadd.f32 %v849_v36, %v848_v32  ;;  %v845_v7 = vadd.f32 %v844_v38, %v843_v29  ;;  %v840_v3 = vadd.f32 %v839_v44, %v838_v52  ;;  %v878_v17 = vsel %vm509_vm3, %v833_v11, %v877_v4 }
 0x426   : > { %v855_v51 = vsel %vm287_vm0, %v811_v41, 0.0  ;;  %v785_v60 = vsel %vm517_vm7, %v775_v46, %v784_v57 }
 0x427   : > { %v851_v55 = vrot.slane %v850_v45, 2  ;;  %v856_v25 = vrot.slane %v855_v51, 4  ;;  %v747_v26 = vpop.permute.xlu0 %746  ;;  %v879_v19 = vsel %vm511_vm4, %v840_v3, %v878_v17 }
 0x428   : > { %v779_v27 = vrot.slane %v747_v26, %v1507_v56  ;;  %v812_v58 = vmul.f32 %v747_v26, %v1484_v9  ;;  %v846_v56 = vrot.slane %v845_v7, 1 }
 0x429   : > { %v852_v59 = vadd.f32 %v851_v55, %v850_v45  ;;  %v857_v33 = vadd.f32 %v856_v25, %v855_v51 }
 0x42a   : > { %v786_v62 = vsel %vm519_vm8, %v779_v27, %v785_v60  ;;  %v862_v40 = vsel %vm287_vm0, %v812_v58, 0.0  ;;  %v847_v14 = vadd.f32 %v846_v56, %v845_v7 }
 0x42b   : > { %v858_v0 = vrot.slane %v857_v33, 2  ;;  %788 = vst.msk [vmem:[%s269_s15] sm:$0xff] %vm522_vm9, %v786_v62  ;;  %v863_v54 = vrot.slane %v862_v40, 4  ;;  %v853_v9 = vrot.slane %v852_v59, 1 }
 0x42c   : > { %v880_v8 = vsel %vm513_vm5, %v847_v14, %v879_v19 }
 0x42d   : > { %v859_v1 = vadd.f32 %v858_v0, %v857_v33  ;;  %v864_v10 = vadd.f32 %v863_v54, %v862_v40  ;;  %v854_v15 = vadd.f32 %v853_v9, %v852_v59 }
 0x42f   : > { %v860_v13 = vrot.slane %v859_v1, 1  ;;  %v865_v2 = vrot.slane %v864_v10, 2  ;;  %v881_v21 = vsel %vm515_vm6, %v854_v15, %v880_v8 }
 0x431   : > { %v866_v16 = vadd.f32 %v865_v2, %v864_v10  ;;  %v861_v18 = vadd.f32 %v860_v13, %v859_v1 }
 0x433   : > { %v867_v20 = vrot.slane %v866_v16, 1  ;;  %v882_v23 = vsel %vm517_vm7, %v861_v18, %v881_v21 }
 0x435   : > { %v868_v22 = vadd.f32 %v867_v20, %v866_v16 }
 0x437   : > { %v883_v24 = vsel %vm519_vm8, %v868_v22, %v882_v23 }
 0x438   : > { %885 = vst.msk [vmem:[%s258_s11] sm:$0xff] %vm287_vm0, %v883_v24 }
 0x439   : > { %1231 = shalt.err (!%p1228_p5)
}
 0x43a   : > { %s1232_s7 = scalar_lea.hbm %s1632_s24, 128  ;;  %s1236_s27 = scalar_lea.hbm %s1675_s4, 256 }
 0x43b   : > { %p1233_p2 = scmp.ne.s32.totalorder %s1632_s24, %s1232_s7  ;;  %p1237_p6 = scmp.lt.s32.totalorder %s1632_s24, %s1675_s4 }
 0x43c   : > { %p1238_p8 = scmp.lt.s32.totalorder %s1236_s27, %s1232_s7 }
 0x43d   : > { %p1234_p1 = pnand %p1233_p2, %p1694_p7 }
 0x43e   : > { %p1239_p3 = por %p1238_p8, %p1237_p6 }
 0x43f   : > { %p1235_p4 = pneg %p1234_p1 }
 0x441   : > { %p1240_p11 = pnand %p1239_p3, %p1235_p4 }
 0x443   : > { %1243 = shalt.err (!%p1240_p11)
}
 0x444   : > { %1074 = dma.vmem_to_hbm [thread:$0]  (%p1694_p7), %s905_s9, 128, %s1632_s24, %s887_s22  }
 0x445 PF: > { %s919_s12 = sand.u32 1, %s1274_s18   ;;  %p1695_p9 = scmp.ne.s32.totalorder %s1683_s25, 0 }
 0x446   : > { %p1696_p10 = scmp.ge.s32.totalorder %s1286_s21, 2  ;;  %s920_s11 = scalar_lea.sflag [#allocation4], %s919_s12 }
 0x448   : > { %p1085_p12 = pnand %p1696_p10, %p1695_p9 }
 0x44a   : > { %p1086_p13 = pneg %p1085_p12 }
 0x44c   : > { %1269 = dma.done.wait (%p1086_p13), %s920_s11, 128  }
 0x44d   : > { %1271 = vsyncadd (%p1086_p13), %s920_s11, 4294967168  ;;  %p20_p0 = scmp.ge.s32.totalorder %s1378_s30, 4   ;;  %s1697_s18 = smov %s1278_s19 }
 0x44e   : > { %s1698_s19 = smov %s1282_s20  ;;  %s1699_s20 = smov %s1398_s13 }
 0x44f   : > { %s1700_s21 = smov %s1378_s30  ;;  %22 = sbr.rel (!%p20_p0) target bundleno = 6 (0x6), region = 97 }
 0x454   :  { %932 = vsyncpa [#allocation3], 1 }
 0x455   :  { %934 = vsyncpa [#allocation3 + $0x1], 1 }
 0x456   :  { %935 = vsyncpa [#allocation6], 1 }
 0x457   :  { %936 = vsyncpa [#allocation4], 1 }
 0x458   :  { %938 = vsyncpa [#allocation4 + $0x1], 1 }

</bundles_post_ra>
